<compile_context>
chip_gen: v5e
topology: v5e:2x2
jax: 0.10.0
libtpu: 0.0.40
codegen_flags: <defaults>
</compile_context>

<pallas_src>
import functools

import jax
import jax.numpy as jnp
from jax.experimental import pallas as pl
from jax.experimental.pallas import tpu as pltpu

EPS = 1e-5          # PyTorch nn.LayerNorm default
FEAT_DIM = 1024     # 512-d CLIP image embedding + 512-d CLIP text embedding


def _round_up(x, m):
    return (x + m - 1) // m * m


def _choose_class_tile(num_classes):
    """Class-axis tile (lane-aligned) and padded class count; shared by fuse_params / wrapper."""
    c128 = _round_up(max(num_classes, 1), 128)
    tn = min(512, c128)
    c_pad = _round_up(c128, tn)
    return tn, c_pad


def _batch_tile_cap():
    """Generation-gated batch-tile cap: 256 on 128-MiB-VMEM chips (v5e/v6e), 128 on v7x."""
    try:
        vmem = pltpu.get_tpu_info().vmem_capacity_bytes
    except Exception:
        vmem = 64 * 1024 * 1024
    return 256 if vmem >= 100 * 1024 * 1024 else 128


# --------------------------------------------------------------------------------------
# Kernel
# --------------------------------------------------------------------------------------
def vqa_kernel(img_ref, q_ref, Wfi_ref, Wfq_ref, bf_ref, W5_ref, b5_ref,
               W2_ref, b2_ref, Wm_ref, bm_ref,
               out_ref, aux_ref,
               hhat_sc, atype_sc,
               *, hidden_size, feat_dim):
    H = hidden_size
    c = pl.program_id(1)                       # class-tile index (innermost, "arbitrary")

    # ---- Stage 1: runs once per batch tile (first class step), results cached in VMEM scratch.
    @pl.when(c == 0)
    def _stage1():
        img = img_ref[...]                     # (tb, 512) f32
        qst = q_ref[...]                       # (tb, 512) f32
        inv_d = 1.0 / feat_dim
        # Shared LayerNorm statistics over the virtual concat [img | qst]; the per-branch
        # affine (gamma/beta) has been folded into Wf/bf at parameter-load time.
        mu = (jnp.sum(img, axis=-1, keepdims=True)
              + jnp.sum(qst, axis=-1, keepdims=True)) * inv_d
        ic = img - mu
        qc = qst - mu
        var = (jnp.sum(ic * ic, axis=-1, keepdims=True)
               + jnp.sum(qc * qc, axis=-1, keepdims=True)) * inv_d
        rstd = jax.lax.rsqrt(var + EPS)
        ihat = (ic * rstd).astype(Wfi_ref.dtype)
        qhat = (qc * rstd).astype(Wfq_ref.dtype)

        # Fused first stage: two K=512 bf16 matmuls against the halves of the (1024, 2H) weight
        # -> ah = [a_answerability | h]  (no in-kernel concat, no HBM round trip for features).
        ah = (jnp.dot(ihat, Wfi_ref[...], preferred_element_type=jnp.float32)
              + jnp.dot(qhat, Wfq_ref[...], preferred_element_type=jnp.float32)
              + bf_ref[...])                   # (tb, 2H) f32

        # Fused second stage: block-diagonal (2H, 128) weight (lanes 5..127 zero-padded)
        # -> lane 0 = answerability logit, lanes 1..4 = answer_type.
        logits = jnp.dot(ah, W5_ref[...],
                         preferred_element_type=jnp.float32) + b5_ref[...]   # (tb, 128)
        lane = jax.lax.broadcasted_iota(jnp.int32, logits.shape, 1)
        # Lane-packed aux output: [sigmoid(ans_logit) | answer_type | don't-care] -> ONE dense
        # full-width store (no masked narrow vst).
        aux_ref[...] = jnp.where(lane == 0, jax.nn.sigmoid(logits), logits)
        atype_sc[...] = logits[:, 1:5]         # cached for the per-class-tile mask FMAs

        # linear_layer2 prologue: LayerNorm(H) (gamma/beta folded into W2/b2), Dropout = id.
        h = ah[:, H:]
        mu2 = jnp.mean(h, axis=-1, keepdims=True)
        hc = h - mu2
        var2 = jnp.mean(hc * hc, axis=-1, keepdims=True)
        hhat_sc[...] = (hc * jax.lax.rsqrt(var2 + EPS)).astype(hhat_sc.dtype)

    # ---- Stage 2: per class tile (streamed W2/Wm/bm/b2 blocks).
    atype = atype_sc[...]                      # (tb, 4)
    # answer_mask = sigmoid(atype @ Wm + bm): K=4 -> 4 broadcast FMAs on the VPU (skip the MXU).
    mlog = bm_ref[...]                         # (1, tn) broadcast
    for j in range(4):
        mlog = mlog + atype[:, j:j + 1] * Wm_ref[j:j + 1, :]
    mask = jax.nn.sigmoid(mlog)                # (tb, tn)

    o = jnp.dot(hhat_sc[...], W2_ref[...],
                preferred_element_type=jnp.float32) + b2_ref[...]            # (tb, tn)
    out_ref[...] = o * mask                    # full dense block store


# --------------------------------------------------------------------------------------
# Wrapper
# --------------------------------------------------------------------------------------
def vqa_forward(image, question, fparams, num_classes, hidden_size):
    B = image.shape[0]
    C, H = num_classes, hidden_size

    # torch.flatten(start_dim=1); image/question stay as two separate kernel inputs (no concat).
    img = image.reshape(B, -1).astype(jnp.float32)
    qst = question.reshape(B, -1).astype(jnp.float32)
    D = img.shape[1] + qst.shape[1]

    tn, C_pad = _choose_class_tile(C)
    tb_cap = _batch_tile_cap()
    if B > tb_cap:
        tb = tb_cap                                        # tile a "parallel" batch grid
    elif B >= 16 and C_pad >= 2048:
        tb = _round_up((B + 1) // 2, 8)                    # 2 parallel tiles -> both v7x TCs
    else:
        tb = B                                             # single batch tile, no padding
    B_pad = _round_up(B, tb)
    if B_pad != B:
        img = jnp.pad(img, ((0, B_pad - B), (0, 0)))
        qst = jnp.pad(qst, ((0, B_pad - B), (0, 0)))

    grid = (B_pad // tb, C_pad // tn)

    Wfi, Wfq, bfu = fparams["Wf_img"], fparams["Wf_q"], fparams["bf"]
    W5, b5 = fparams["W5"], fparams["b5"]
    W2, b2 = fparams["W2"], fparams["b2"]
    Wm, bm = fparams["Wm"], fparams["bm"]

    # Grid-invariant weights: full-array VMEM residency (single-buffered, outside the pipeline).
    vmem_res = pl.BlockSpec(memory_space=pltpu.MemorySpace.VMEM)

    # Advisory cost estimate for XLA scheduling around the custom call.
    flops = (2 * B_pad * D * (2 * H) + 2 * B_pad * (2 * H) * 128
             + 2 * B_pad * H * C_pad + 8 * B_pad * C_pad)
    transcendentals = B_pad * (C_pad + 128) + 2 * B_pad
    bytes_accessed = (B_pad * D * 4                                  # image + question
                      + (Wfi.size + Wfq.size + W2.size) * 2          # bf16 weights
                      + (bfu.size + W5.size + b5.size + b2.size + Wm.size + bm.size) * 4
                      + B_pad * C_pad * 4 + B_pad * 128 * 4)         # outputs

    # Explicit VMEM budget: resident weights + double-buffered class-streamed tiles + I/O tiles
    # + scratch + headroom, clamped so it stays inside v7x's 64 MiB physical VMEM.
    vmem_est = ((Wfi.size + Wfq.size) * 2 + (bfu.size + W5.size + b5.size) * 4
                + 2 * (H * tn * 2 + 6 * tn * 4)        # W2(bf16) + b2/Wm/bm(f32) class tiles x2
                + 2 * B_pad * D * 4 // (B_pad // tb)   # input tiles, double-buffered
                + 2 * (tb * tn * 4 + tb * 128 * 4)     # output tiles, double-buffered
                + tb * H * 2 + tb * 128 * 4)           # scratch (hhat bf16, atype)
    vmem_limit = int(min(max(vmem_est + (8 << 20), 32 << 20), 48 << 20))

    kernel = functools.partial(vqa_kernel, hidden_size=H, feat_dim=D)

    out_pad, aux = pl.pallas_call(
        kernel,
        out_shape=(jax.ShapeDtypeStruct((B_pad, C_pad), jnp.float32),
                   jax.ShapeDtypeStruct((B_pad, 128), jnp.float32)),
        grid=grid,
        in_specs=[
            pl.BlockSpec((tb, img.shape[1]), lambda i, c: (i, 0)),   # image embeddings
            pl.BlockSpec((tb, qst.shape[1]), lambda i, c: (i, 0)),   # question embeddings
            vmem_res, vmem_res, vmem_res, vmem_res, vmem_res,        # Wf_img, Wf_q, bf, W5, b5
            pl.BlockSpec((H, tn), lambda i, c: (0, c)),              # W2   (class-streamed)
            pl.BlockSpec((1, tn), lambda i, c: (0, c)),              # b2
            pl.BlockSpec((4, tn), lambda i, c: (0, c)),              # Wm
            pl.BlockSpec((1, tn), lambda i, c: (0, c)),              # bm
        ],
        out_specs=(pl.BlockSpec((tb, tn), lambda i, c: (i, c)),      # masked output
                   pl.BlockSpec((tb, 128), lambda i, c: (i, 0))),    # aux (resident across c)
        scratch_shapes=[pltpu.VMEM((tb, H), jnp.bfloat16),           # hhat cache
                        pltpu.VMEM((tb, 4), jnp.float32)],           # answer_type cache
        compiler_params=pltpu.CompilerParams(
            dimension_semantics=("parallel", "arbitrary"),
            vmem_limit_bytes=vmem_limit),
        cost_estimate=pl.CostEstimate(flops=flops,
                                      transcendentals=transcendentals,
                                      bytes_accessed=bytes_accessed),
    )(img, qst, Wfi, Wfq, bfu, W5, b5, W2, b2, Wm, bm)

    out = out_pad[:B, :C]
    atype = aux[:B, 1:5]
    ans = aux[:B, 0]          # == .squeeze() of the (B, 1) answerability score
    return out, atype, ans


# --------------------------------------------------------------------------------------
# Parameters: init (PyTorch-layout), one-time constant folding / fusion
# --------------------------------------------------------------------------------------
def init_params(key, num_classes, hidden_size, feat_dim=FEAT_DIM):
    ks = jax.random.split(key, 9)
    scale = 0.02

    def lin(k, din, dout):
        kw, kb = jax.random.split(k)
        return (scale * jax.random.normal(kw, (din, dout), jnp.float32),
                scale * jax.random.normal(kb, (1, dout), jnp.float32))

    def ln(k, d):
        kg, kb = jax.random.split(k)
        return (1.0 + 0.1 * jax.random.normal(kg, (1, d), jnp.float32),
                0.1 * jax.random.normal(kb, (1, d), jnp.float32))

    p = {}
    p["gA"], p["bA"] = ln(ks[0], feat_dim)                   # answerability LayerNorm(1024)
    p["WA"], p["bAw"] = lin(ks[1], feat_dim, hidden_size)    # answerability Linear(1024, H)
    p["WA2"], p["bA2"] = lin(ks[2], hidden_size, 1)          # answerability_final Linear(H, 1)
    p["g1"], p["b1"] = ln(ks[3], feat_dim)                   # linear_layer1 LayerNorm(1024)
    p["W1"], p["b1w"] = lin(ks[4], feat_dim, hidden_size)    # linear_layer1 Linear(1024, H)
    p["Wt"], p["bt"] = lin(ks[5], hidden_size, 4)            # answer_type Linear(H, 4)
    p["Wm"], p["bm"] = lin(ks[6], 4, num_classes)            # answer_mask Linear(4, C)
    p["g2"], p["b2"] = ln(ks[7], hidden_size)                # linear_layer2 LayerNorm(H)
    p["W2"], p["b2w"] = lin(ks[8], hidden_size, num_classes) # linear_layer2 Linear(H, C)
    return p


def fuse_params(p, num_classes):
    """One-time constant fold: LN gamma into weights / beta into biases, fuse the two 1024->H
    matmuls into a (1024, 2H) weight split into image/question halves, fuse the H->1 / H->4 heads
    into a block-diagonal (2H, 128) zero-padded weight, zero-pad the class axis to the class-tile
    multiple, and cast the large weights to bf16."""
    WA_f = p["gA"].reshape(-1, 1) * p["WA"]
    bA_f = p["bA"] @ p["WA"] + p["bAw"]
    W1_f = p["g1"].reshape(-1, 1) * p["W1"]
    b1_f = p["b1"] @ p["W1"] + p["b1w"]
    Wf = jnp.concatenate([WA_f, W1_f], axis=1)               # (1024, 2H)
    bfu = jnp.concatenate([bA_f, b1_f], axis=1)              # (1, 2H)
    Dh = Wf.shape[0] // 2
    Wf_img, Wf_q = Wf[:Dh], Wf[Dh:]

    H = p["WA2"].shape[0]
    W5 = jnp.zeros((2 * H, 128), jnp.float32)
    W5 = W5.at[:H, 0:1].set(p["WA2"])                        # lane 0  <- answerability head
    W5 = W5.at[H:, 1:5].set(p["Wt"])                         # lanes 1..4 <- answer_type head
    b5 = jnp.zeros((1, 128), jnp.float32)
    b5 = b5.at[:, 0:1].set(p["bA2"])
    b5 = b5.at[:, 1:5].set(p["bt"])

    W2_f = p["g2"].reshape(-1, 1) * p["W2"]
    b2_f = p["b2"] @ p["W2"] + p["b2w"]

    _, c_pad = _choose_class_tile(num_classes)
    pad = c_pad - num_classes
    W2_f = jnp.pad(W2_f, ((0, 0), (0, pad)))
    b2_f = jnp.pad(b2_f, ((0, 0), (0, pad)))
    Wm_p = jnp.pad(p["Wm"], ((0, 0), (0, pad)))
    bm_p = jnp.pad(p["bm"], ((0, 0), (0, pad)))

    return {
        "Wf_img": Wf_img.astype(jnp.bfloat16), "Wf_q": Wf_q.astype(jnp.bfloat16), "bf": bfu,
        "W5": W5, "b5": b5,
        "W2": W2_f.astype(jnp.bfloat16), "b2": b2_f,
        "Wm": Wm_p, "bm": bm_p,
    }


# --------------------------------------------------------------------------------------
# References
# --------------------------------------------------------------------------------------
def _layernorm(x, gamma, beta):
    mu = jnp.mean(x, axis=-1, keepdims=True)
    var = jnp.mean((x - mu) ** 2, axis=-1, keepdims=True)
    return (x - mu) * jax.lax.rsqrt(var + EPS) * gamma + beta


def reference_forward(image, question, p):
    """Pure-JAX f32 reference matching the PyTorch eval-mode forward exactly."""
    B = image.shape[0]
    feats = jnp.concatenate([image.reshape(B, -1), question.reshape(B, -1)], axis=1)
    a = _layernorm(feats, p["gA"], p["bA"]) @ p["WA"] + p["bAw"]
    a = a @ p["WA2"] + p["bA2"]
    ans = jax.nn.sigmoid(a).squeeze(-1)
    h = _layernorm(feats, p["g1"], p["b1"]) @ p["W1"] + p["b1w"]
    atype = h @ p["Wt"] + p["bt"]
    mask = jax.nn.sigmoid(atype @ p["Wm"] + p["bm"])
    o = _layernorm(h, p["g2"], p["b2"]) @ p["W2"] + p["b2w"]
    return o * mask, atype, ans


def fused_reference(image, question, fp, num_classes, hidden_size):
    """Pure-JAX reference of the fused/bf16-quantized math (same params as the kernel)."""
    hp = jax.lax.Precision.HIGHEST
    B, C = image.shape[0], num_classes
    feats = jnp.concatenate([image.reshape(B, -1), question.reshape(B, -1)], axis=1)
    mu = jnp.mean(feats, axis=-1, keepdims=True)
    xc = feats - mu
    var = jnp.mean(xc * xc, axis=-1, keepdims=True)
    xhat = xc * jax.lax.rsqrt(var + EPS)
    xq = xhat.astype(jnp.bfloat16).astype(jnp.float32)
    Wf = jnp.concatenate([fp["Wf_img"], fp["Wf_q"]], axis=0).astype(jnp.float32)
    ah = jnp.dot(xq, Wf, precision=hp) + fp["bf"]
    logits = jnp.dot(ah, fp["W5"], precision=hp) + fp["b5"]
    ans = jax.nn.sigmoid(logits[:, 0])
    atype = logits[:, 1:5]
    mask = jax.nn.sigmoid(jnp.dot(atype, fp["Wm"][:, :C], precision=hp) + fp["bm"][:, :C])
    h = ah[:, hidden_size:]
    mu2 = jnp.mean(h, axis=-1, keepdims=True)
    hc = h - mu2
    var2 = jnp.mean(hc * hc, axis=-1, keepdims=True)
    hhat = hc * jax.lax.rsqrt(var2 + EPS)
    hq = hhat.astype(jnp.bfloat16).astype(jnp.float32)
    o = jnp.dot(hq, fp["W2"][:, :C].astype(jnp.float32), precision=hp) + fp["b2"][:, :C]
    return o * mask, atype, ans


# --------------------------------------------------------------------------------------
# Main
# --------------------------------------------------------------------------------------
if __name__ == "__main__":
    num_classes = 16
    hidden_size = 32
    batch = 4

    key = jax.random.PRNGKey(0)
    k_img, k_q, k_p = jax.random.split(key, 3)
    # CLIP ViT-B/32 embeddings: 512-d image features, 512-d text features.
    image = jax.random.normal(k_img, (batch, 512), jnp.float32)
    question = jax.random.normal(k_q, (batch, 512), jnp.float32)

    params = init_params(k_p, num_classes, hidden_size)
    fparams = fuse_params(params, num_classes)   # one-time constant fold + bf16 cast + class pad

    fwd = jax.jit(functools.partial(vqa_forward, num_classes=num_classes,
                                    hidden_size=hidden_size))
    out, atype, ans = fwd(image, question, fparams)
    jax.block_until_ready((out, atype, ans))

    assert out.shape == (batch, num_classes)
    assert atype.shape == (batch, 4)
    assert ans.shape == (batch,)

    # Tight check: kernel vs pure-JAX reference of the identical fused/bf16 parameters.
    q_out, q_atype, q_ans = fused_reference(image, question, fparams, num_classes, hidden_size)
    assert jnp.allclose(out, q_out, atol=2e-3, rtol=2e-3)
    assert jnp.allclose(atype, q_atype, atol=2e-3, rtol=2e-3)
    assert jnp.allclose(ans, q_ans, atol=2e-3, rtol=2e-3)

    # Loose check: kernel vs f32 PyTorch-semantics reference (difference = bf16 weight quantization).
    r_out, r_atype, r_ans = reference_forward(image, question, params)
    assert jnp.allclose(out, r_out, atol=5e-2, rtol=5e-2)
    assert jnp.allclose(atype, r_atype, atol=5e-2, rtol=5e-2)
    assert jnp.allclose(ans, r_ans, atol=5e-2, rtol=5e-2)

    print("KERNEL_OK")
</pallas_src>

<mosaic_0001>
module attributes {stable_mosaic.version = 11 : i64} {
  func.func @vqa_kernel(%arg0: i32, %arg1: i32, %arg2: memref<4x512xf32, #tpu.memory_space<vmem>>, %arg3: memref<4x512xf32, #tpu.memory_space<vmem>>, %arg4: memref<512x64xbf16, #tpu.memory_space<vmem>>, %arg5: memref<512x64xbf16, #tpu.memory_space<vmem>>, %arg6: memref<1x64xf32, #tpu.memory_space<vmem>>, %arg7: memref<64x128xf32, #tpu.memory_space<vmem>>, %arg8: memref<1x128xf32, #tpu.memory_space<vmem>>, %arg9: memref<32x128xbf16, #tpu.memory_space<vmem>>, %arg10: memref<1x128xf32, #tpu.memory_space<vmem>>, %arg11: memref<4x128xf32, #tpu.memory_space<vmem>>, %arg12: memref<1x128xf32, #tpu.memory_space<vmem>>, %arg13: memref<4x128xf32, #tpu.memory_space<vmem>>, %arg14: memref<4x128xf32, #tpu.memory_space<vmem>>, %arg15: memref<4x32xbf16, #tpu.memory_space<vmem>>, %arg16: memref<4x4xf32, #tpu.memory_space<vmem>>) attributes {dimension_semantics = [#tpu.dimension_semantics<parallel>, #tpu.dimension_semantics<arbitrary>], iteration_bounds = array<i64: 1, 1>, scalar_prefetch = 0 : i64, scratch_operands = 2 : i64, tpu.core_type = #tpu.core_type<tc>, window_params = [{transform_indices = @transform_0, window_bounds = array<i64: 4, 512>}, {transform_indices = @transform_1, window_bounds = array<i64: 4, 512>}, {pipeline_mode = #tpu.pipeline_mode<synchronous>, transform_indices = @transform_2, window_bounds = array<i64: 512, 64>}, {pipeline_mode = #tpu.pipeline_mode<synchronous>, transform_indices = @transform_3, window_bounds = array<i64: 512, 64>}, {pipeline_mode = #tpu.pipeline_mode<synchronous>, transform_indices = @transform_4, window_bounds = array<i64: 1, 64>}, {pipeline_mode = #tpu.pipeline_mode<synchronous>, transform_indices = @transform_5, window_bounds = array<i64: 64, 128>}, {pipeline_mode = #tpu.pipeline_mode<synchronous>, transform_indices = @transform_6, window_bounds = array<i64: 1, 128>}, {transform_indices = @transform_7, window_bounds = array<i64: 32, 128>}, {transform_indices = @transform_8, window_bounds = array<i64: 1, 128>}, {transform_indices = @transform_9, window_bounds = array<i64: 4, 128>}, {transform_indices = @transform_10, window_bounds = array<i64: 1, 128>}, {transform_indices = @transform_11, window_bounds = array<i64: 4, 128>}, {transform_indices = @transform_12, window_bounds = array<i64: 4, 128>}]} {
    %c0_i32 = arith.constant 0 : i32
    %0 = arith.cmpi eq, %arg1, %c0_i32 : i32
    %1 = arith.extui %0 : i1 to i32
    %c0_i32_0 = arith.constant 0 : i32
    %2 = arith.cmpi ne, %1, %c0_i32_0 : i32
    scf.if %2 {
      %c0_18 = arith.constant 0 : index
      %c0_19 = arith.constant 0 : index
      %43 = vector.load %arg2[%c0_18, %c0_19] : memref<4x512xf32, #tpu.memory_space<vmem>>, vector<4x512xf32>
      %c0_20 = arith.constant 0 : index
      %c0_21 = arith.constant 0 : index
      %44 = vector.load %arg3[%c0_20, %c0_21] : memref<4x512xf32, #tpu.memory_space<vmem>>, vector<4x512xf32>
      %cst_22 = arith.constant dense<0.000000e+00> : vector<4xf32>
      %45 = vector.multi_reduction <add>, %43, %cst_22 [1] : vector<4x512xf32> to vector<4xf32>
      %46 = vector.shape_cast %45 : vector<4xf32> to vector<4x1xf32>
      %cst_23 = arith.constant dense<0.000000e+00> : vector<4xf32>
      %47 = vector.multi_reduction <add>, %44, %cst_23 [1] : vector<4x512xf32> to vector<4xf32>
      %48 = vector.shape_cast %47 : vector<4xf32> to vector<4x1xf32>
      %49 = arith.addf %46, %48 : vector<4x1xf32>
      %cst_24 = arith.constant 9.765625E-4 : f32
      %50 = vector.broadcast %cst_24 : f32 to vector<4x1xf32>
      %51 = arith.mulf %49, %50 : vector<4x1xf32>
      %52 = vector.broadcast %51 : vector<4x1xf32> to vector<4x512xf32>
      %53 = arith.subf %43, %52 : vector<4x512xf32>
      %54 = vector.broadcast %51 : vector<4x1xf32> to vector<4x512xf32>
      %55 = arith.subf %44, %54 : vector<4x512xf32>
      %56 = arith.mulf %53, %53 : vector<4x512xf32>
      %cst_25 = arith.constant dense<0.000000e+00> : vector<4xf32>
      %57 = vector.multi_reduction <add>, %56, %cst_25 [1] : vector<4x512xf32> to vector<4xf32>
      %58 = vector.shape_cast %57 : vector<4xf32> to vector<4x1xf32>
      %59 = arith.mulf %55, %55 : vector<4x512xf32>
      %cst_26 = arith.constant dense<0.000000e+00> : vector<4xf32>
      %60 = vector.multi_reduction <add>, %59, %cst_26 [1] : vector<4x512xf32> to vector<4xf32>
      %61 = vector.shape_cast %60 : vector<4xf32> to vector<4x1xf32>
      %62 = arith.addf %58, %61 : vector<4x1xf32>
      %cst_27 = arith.constant 9.765625E-4 : f32
      %63 = vector.broadcast %cst_27 : f32 to vector<4x1xf32>
      %64 = arith.mulf %62, %63 : vector<4x1xf32>
      %cst_28 = arith.constant 9.99999974E-6 : f32
      %65 = vector.broadcast %cst_28 : f32 to vector<4x1xf32>
      %66 = arith.addf %64, %65 : vector<4x1xf32>
      %67 = math.rsqrt %66 : vector<4x1xf32>
      %68 = vector.broadcast %67 : vector<4x1xf32> to vector<4x512xf32>
      %69 = arith.mulf %53, %68 : vector<4x512xf32>
      %70 = arith.truncf %69 : vector<4x512xf32> to vector<4x512xbf16>
      %71 = vector.broadcast %67 : vector<4x1xf32> to vector<4x512xf32>
      %72 = arith.mulf %55, %71 : vector<4x512xf32>
      %73 = arith.truncf %72 : vector<4x512xf32> to vector<4x512xbf16>
      %c0_29 = arith.constant 0 : index
      %c0_30 = arith.constant 0 : index
      %74 = vector.load %arg4[%c0_29, %c0_30] : memref<512x64xbf16, #tpu.memory_space<vmem>>, vector<512x64xbf16>
      %cst_31 = arith.constant dense<0.000000e+00> : vector<4x64xf32>
      %75 = tpu.matmul %70, %74, %cst_31 {dimension_numbers = #tpu.dot_dimension_numbers<[1], [0], [0], [1], [0, 0, 1, 1], [], []>} : vector<4x512xbf16>, vector<512x64xbf16>, vector<4x64xf32> -> vector<4x64xf32>
      %c0_32 = arith.constant 0 : index
      %c0_33 = arith.constant 0 : index
      %76 = vector.load %arg5[%c0_32, %c0_33] : memref<512x64xbf16, #tpu.memory_space<vmem>>, vector<512x64xbf16>
      %cst_34 = arith.constant dense<0.000000e+00> : vector<4x64xf32>
      %77 = tpu.matmul %73, %76, %cst_34 {dimension_numbers = #tpu.dot_dimension_numbers<[1], [0], [0], [1], [0, 0, 1, 1], [], []>} : vector<4x512xbf16>, vector<512x64xbf16>, vector<4x64xf32> -> vector<4x64xf32>
      %78 = arith.addf %75, %77 : vector<4x64xf32>
      %c0_35 = arith.constant 0 : index
      %c0_36 = arith.constant 0 : index
      %79 = vector.load %arg6[%c0_35, %c0_36] : memref<1x64xf32, #tpu.memory_space<vmem>>, vector<1x64xf32>
      %80 = vector.broadcast %79 : vector<1x64xf32> to vector<4x64xf32>
      %81 = arith.addf %78, %80 : vector<4x64xf32>
      %c0_37 = arith.constant 0 : index
      %c0_38 = arith.constant 0 : index
      %82 = vector.load %arg7[%c0_37, %c0_38] : memref<64x128xf32, #tpu.memory_space<vmem>>, vector<64x128xf32>
      %cst_39 = arith.constant dense<0.000000e+00> : vector<4x128xf32>
      %83 = tpu.matmul %81, %82, %cst_39 {dimension_numbers = #tpu.dot_dimension_numbers<[1], [0], [0], [1], [0, 0, 1, 1], [], []>} : vector<4x64xf32>, vector<64x128xf32>, vector<4x128xf32> -> vector<4x128xf32>
      %c0_40 = arith.constant 0 : index
      %c0_41 = arith.constant 0 : index
      %84 = vector.load %arg8[%c0_40, %c0_41] : memref<1x128xf32, #tpu.memory_space<vmem>>, vector<1x128xf32>
      %85 = vector.broadcast %84 : vector<1x128xf32> to vector<4x128xf32>
      %86 = arith.addf %83, %85 : vector<4x128xf32>
      %87 = tpu.iota {dimensions = array<i32: 1>} : vector<4x128xi32>
      %c0_i32_42 = arith.constant 0 : i32
      %88 = vector.broadcast %c0_i32_42 : i32 to vector<4x128xi32>
      %89 = arith.cmpi eq, %87, %88 : vector<4x128xi32>
      %90 = arith.negf %86 : vector<4x128xf32>
      %91 = math.exp %90 : vector<4x128xf32>
      %cst_43 = arith.constant 1.000000e+00 : f32
      %92 = vector.broadcast %cst_43 : f32 to vector<4x128xf32>
      %93 = arith.addf %92, %91 : vector<4x128xf32>
      %94 = arith.divf %92, %93 : vector<4x128xf32>
      %95 = arith.select %89, %94, %86 : vector<4x128xi1>, vector<4x128xf32>
      %c0_44 = arith.constant 0 : index
      %c0_45 = arith.constant 0 : index
      %96 = vector.load %arg14[%c0_44, %c0_45] : memref<4x128xf32, #tpu.memory_space<vmem>>, vector<4x128xf32>
      tpu.vector_store %arg14[%c0_44, %c0_45], %95 {strides = array<i32>} : memref<4x128xf32, #tpu.memory_space<vmem>>, vector<4x128xf32>,
      %97 = vector.extract_strided_slice %86 {offsets = [0, 1], sizes = [4, 4], strides = [1, 1]} : vector<4x128xf32> to vector<4x4xf32>
      %c0_46 = arith.constant 0 : index
      %c0_47 = arith.constant 0 : index
      %98 = vector.load %arg16[%c0_46, %c0_47] : memref<4x4xf32, #tpu.memory_space<vmem>>, vector<4x4xf32>
      tpu.vector_store %arg16[%c0_46, %c0_47], %97 {strides = array<i32>} : memref<4x4xf32, #tpu.memory_space<vmem>>, vector<4x4xf32>,
      %99 = vector.extract_strided_slice %81 {offsets = [0, 32], sizes = [4, 32], strides = [1, 1]} : vector<4x64xf32> to vector<4x32xf32>
      %cst_48 = arith.constant dense<0.000000e+00> : vector<4xf32>
      %100 = vector.multi_reduction <add>, %99, %cst_48 [1] : vector<4x32xf32> to vector<4xf32>
      %101 = vector.shape_cast %100 : vector<4xf32> to vector<4x1xf32>
      %cst_49 = arith.constant 3.200000e+01 : f32
      %102 = vector.broadcast %cst_49 : f32 to vector<4x1xf32>
      %103 = arith.divf %101, %102 : vector<4x1xf32>
      %104 = vector.broadcast %103 : vector<4x1xf32> to vector<4x32xf32>
      %105 = arith.subf %99, %104 : vector<4x32xf32>
      %106 = arith.mulf %105, %105 : vector<4x32xf32>
      %cst_50 = arith.constant dense<0.000000e+00> : vector<4xf32>
      %107 = vector.multi_reduction <add>, %106, %cst_50 [1] : vector<4x32xf32> to vector<4xf32>
      %108 = vector.shape_cast %107 : vector<4xf32> to vector<4x1xf32>
      %cst_51 = arith.constant 3.200000e+01 : f32
      %109 = vector.broadcast %cst_51 : f32 to vector<4x1xf32>
      %110 = arith.divf %108, %109 : vector<4x1xf32>
      %cst_52 = arith.constant 9.99999974E-6 : f32
      %111 = vector.broadcast %cst_52 : f32 to vector<4x1xf32>
      %112 = arith.addf %110, %111 : vector<4x1xf32>
      %113 = math.rsqrt %112 : vector<4x1xf32>
      %114 = vector.broadcast %113 : vector<4x1xf32> to vector<4x32xf32>
      %115 = arith.mulf %105, %114 : vector<4x32xf32>
      %116 = arith.truncf %115 : vector<4x32xf32> to vector<4x32xbf16>
      %c0_53 = arith.constant 0 : index
      %c0_54 = arith.constant 0 : index
      %117 = vector.load %arg15[%c0_53, %c0_54] : memref<4x32xbf16, #tpu.memory_space<vmem>>, vector<4x32xbf16>
      tpu.vector_store %arg15[%c0_53, %c0_54], %116 {strides = array<i32>} : memref<4x32xbf16, #tpu.memory_space<vmem>>, vector<4x32xbf16>,
    } else {
    }
    %c0 = arith.constant 0 : index
    %c0_1 = arith.constant 0 : index
    %3 = vector.load %arg16[%c0, %c0_1] : memref<4x4xf32, #tpu.memory_space<vmem>>, vector<4x4xf32>
    %c0_2 = arith.constant 0 : index
    %c0_3 = arith.constant 0 : index
    %4 = vector.load %arg12[%c0_2, %c0_3] : memref<1x128xf32, #tpu.memory_space<vmem>>, vector<1x128xf32>
    %5 = vector.extract_strided_slice %3 {offsets = [0, 0], sizes = [4, 1], strides = [1, 1]} : vector<4x4xf32> to vector<4x1xf32>
    %c0_4 = arith.constant 0 : index
    %c0_5 = arith.constant 0 : index
    %6 = vector.load %arg11[%c0_4, %c0_5] : memref<4x128xf32, #tpu.memory_space<vmem>>, vector<1x128xf32>
    %7 = vector.broadcast %5 : vector<4x1xf32> to vector<4x128xf32>
    %8 = vector.broadcast %6 : vector<1x128xf32> to vector<4x128xf32>
    %9 = arith.mulf %7, %8 : vector<4x128xf32>
    %10 = vector.broadcast %4 : vector<1x128xf32> to vector<4x128xf32>
    %11 = arith.addf %10, %9 : vector<4x128xf32>
    %12 = vector.extract_strided_slice %3 {offsets = [0, 1], sizes = [4, 1], strides = [1, 1]} : vector<4x4xf32> to vector<4x1xf32>
    %c1 = arith.constant 1 : index
    %c0_6 = arith.constant 0 : index
    %13 = vector.load %arg11[%c1, %c0_6] : memref<4x128xf32, #tpu.memory_space<vmem>>, vector<1x128xf32>
    %14 = vector.broadcast %12 : vector<4x1xf32> to vector<4x128xf32>
    %15 = vector.broadcast %13 : vector<1x128xf32> to vector<4x128xf32>
    %16 = arith.mulf %14, %15 : vector<4x128xf32>
    %17 = arith.addf %11, %16 : vector<4x128xf32>
    %18 = vector.extract_strided_slice %3 {offsets = [0, 2], sizes = [4, 1], strides = [1, 1]} : vector<4x4xf32> to vector<4x1xf32>
    %c2 = arith.constant 2 : index
    %c0_7 = arith.constant 0 : index
    %19 = vector.load %arg11[%c2, %c0_7] : memref<4x128xf32, #tpu.memory_space<vmem>>, vector<1x128xf32>
    %20 = vector.broadcast %18 : vector<4x1xf32> to vector<4x128xf32>
    %21 = vector.broadcast %19 : vector<1x128xf32> to vector<4x128xf32>
    %22 = arith.mulf %20, %21 : vector<4x128xf32>
    %23 = arith.addf %17, %22 : vector<4x128xf32>
    %24 = vector.extract_strided_slice %3 {offsets = [0, 3], sizes = [4, 1], strides = [1, 1]} : vector<4x4xf32> to vector<4x1xf32>
    %c3 = arith.constant 3 : index
    %c0_8 = arith.constant 0 : index
    %25 = vector.load %arg11[%c3, %c0_8] : memref<4x128xf32, #tpu.memory_space<vmem>>, vector<1x128xf32>
    %26 = vector.broadcast %24 : vector<4x1xf32> to vector<4x128xf32>
    %27 = vector.broadcast %25 : vector<1x128xf32> to vector<4x128xf32>
    %28 = arith.mulf %26, %27 : vector<4x128xf32>
    %29 = arith.addf %23, %28 : vector<4x128xf32>
    %30 = arith.negf %29 : vector<4x128xf32>
    %31 = math.exp %30 : vector<4x128xf32>
    %cst = arith.constant 1.000000e+00 : f32
    %32 = vector.broadcast %cst : f32 to vector<4x128xf32>
    %33 = arith.addf %32, %31 : vector<4x128xf32>
    %34 = arith.divf %32, %33 : vector<4x128xf32>
    %c0_9 = arith.constant 0 : index
    %c0_10 = arith.constant 0 : index
    %35 = vector.load %arg15[%c0_9, %c0_10] : memref<4x32xbf16, #tpu.memory_space<vmem>>, vector<4x32xbf16>
    %c0_11 = arith.constant 0 : index
    %c0_12 = arith.constant 0 : index
    %36 = vector.load %arg9[%c0_11, %c0_12] : memref<32x128xbf16, #tpu.memory_space<vmem>>, vector<32x128xbf16>
    %cst_13 = arith.constant dense<0.000000e+00> : vector<4x128xf32>
    %37 = tpu.matmul %35, %36, %cst_13 {dimension_numbers = #tpu.dot_dimension_numbers<[1], [0], [0], [1], [0, 0, 1, 1], [], []>} : vector<4x32xbf16>, vector<32x128xbf16>, vector<4x128xf32> -> vector<4x128xf32>
    %c0_14 = arith.constant 0 : index
    %c0_15 = arith.constant 0 : index
    %38 = vector.load %arg10[%c0_14, %c0_15] : memref<1x128xf32, #tpu.memory_space<vmem>>, vector<1x128xf32>
    %39 = vector.broadcast %38 : vector<1x128xf32> to vector<4x128xf32>
    %40 = arith.addf %37, %39 : vector<4x128xf32>
    %41 = arith.mulf %40, %34 : vector<4x128xf32>
    %c0_16 = arith.constant 0 : index
    %c0_17 = arith.constant 0 : index
    %42 = vector.load %arg13[%c0_16, %c0_17] : memref<4x128xf32, #tpu.memory_space<vmem>>, vector<4x128xf32>
    tpu.vector_store %arg13[%c0_16, %c0_17], %41 {strides = array<i32>} : memref<4x128xf32, #tpu.memory_space<vmem>>, vector<4x128xf32>,
    return
  }
  func.func @transform_0(%arg0: i32, %arg1: i32) -> (i32, i32) {
    %c0_i32 = arith.constant 0 : i32
    %c0_i32_0 = arith.constant 0 : i32
    return %arg0, %c0_i32 : i32, i32
  }
  func.func @transform_1(%arg0: i32, %arg1: i32) -> (i32, i32) {
    %c0_i32 = arith.constant 0 : i32
    %c0_i32_0 = arith.constant 0 : i32
    return %arg0, %c0_i32 : i32, i32
  }
  func.func @transform_2(%arg0: i32, %arg1: i32) -> (i32, i32) {
    %c0_i32 = arith.constant 0 : i32
    %c0_i32_0 = arith.constant 0 : i32
    %c0_i32_1 = arith.constant 0 : i32
    return %c0_i32, %c0_i32_0 : i32, i32
  }
  func.func @transform_3(%arg0: i32, %arg1: i32) -> (i32, i32) {
    %c0_i32 = arith.constant 0 : i32
    %c0_i32_0 = arith.constant 0 : i32
    %c0_i32_1 = arith.constant 0 : i32
    return %c0_i32, %c0_i32_0 : i32, i32
  }
  func.func @transform_4(%arg0: i32, %arg1: i32) -> (i32, i32) {
    %c0_i32 = arith.constant 0 : i32
    %c0_i32_0 = arith.constant 0 : i32
    %c0_i32_1 = arith.constant 0 : i32
    return %c0_i32, %c0_i32_0 : i32, i32
  }
  func.func @transform_5(%arg0: i32, %arg1: i32) -> (i32, i32) {
    %c0_i32 = arith.constant 0 : i32
    %c0_i32_0 = arith.constant 0 : i32
    %c0_i32_1 = arith.constant 0 : i32
    return %c0_i32, %c0_i32_0 : i32, i32
  }
  func.func @transform_6(%arg0: i32, %arg1: i32) -> (i32, i32) {
    %c0_i32 = arith.constant 0 : i32
    %c0_i32_0 = arith.constant 0 : i32
    %c0_i32_1 = arith.constant 0 : i32
    return %c0_i32, %c0_i32_0 : i32, i32
  }
  func.func @transform_7(%arg0: i32, %arg1: i32) -> (i32, i32) {
    %c0_i32 = arith.constant 0 : i32
    %c0_i32_0 = arith.constant 0 : i32
    return %c0_i32, %arg1 : i32, i32
  }
  func.func @transform_8(%arg0: i32, %arg1: i32) -> (i32, i32) {
    %c0_i32 = arith.constant 0 : i32
    %c0_i32_0 = arith.constant 0 : i32
    return %c0_i32, %arg1 : i32, i32
  }
  func.func @transform_9(%arg0: i32, %arg1: i32) -> (i32, i32) {
    %c0_i32 = arith.constant 0 : i32
    %c0_i32_0 = arith.constant 0 : i32
    return %c0_i32, %arg1 : i32, i32
  }
  func.func @transform_10(%arg0: i32, %arg1: i32) -> (i32, i32) {
    %c0_i32 = arith.constant 0 : i32
    %c0_i32_0 = arith.constant 0 : i32
    return %c0_i32, %arg1 : i32, i32
  }
  func.func @transform_11(%arg0: i32, %arg1: i32) -> (i32, i32) {
    %c0_i32 = arith.constant 0 : i32
    return %arg0, %arg1 : i32, i32
  }
  func.func @transform_12(%arg0: i32, %arg1: i32) -> (i32, i32) {
    %c0_i32 = arith.constant 0 : i32
    %c0_i32_0 = arith.constant 0 : i32
    return %arg0, %c0_i32 : i32, i32
  }
}

</mosaic_0001>

<bundles_post_ra>
// kernel: vqa_forward.1
= control target key start
LH: loop header
LB: loop body
LE: loop exit
PB: predicated region body
PF: predicated region fallthrough
CT: control target
= control target key end

     0   :  { %s1848_s0 = inlined_call_operand.vmem [shape: f32[4,512], index: 0, kind: input, shape index: {}]   ;;  %s1849_s1 = inlined_call_operand.vmem [shape: f32[4,512], index: 1, kind: input, shape index: {}]   ;;  %s1850_s2 = inlined_call_operand.vmem [shape: bf16[512,64], index: 2, kind: input, shape index: {}]   ;;  %s1851_s3 = inlined_call_operand.vmem [shape: bf16[512,64], index: 3, kind: input, shape index: {}]   ;;  %s1852_s4 = inlined_call_operand.vmem [shape: f32[1,64], index: 4, kind: input, shape index: {}]   ;;  %s1853_s5 = inlined_call_operand.vmem [shape: f32[64,128], index: 5, kind: input, shape index: {}]   ;;  %s1854_s6 = inlined_call_operand.vmem [shape: f32[1,128], index: 6, kind: input, shape index: {}]   ;;  %s1855_s7 = inlined_call_operand.vmem [shape: bf16[32,128], index: 7, kind: input, shape index: {}]   ;;  %s1856_s8 = inlined_call_operand.vmem [shape: f32[1,128], index: 8, kind: input, shape index: {}]   ;;  %s1857_s9 = inlined_call_operand.vmem [shape: f32[4,128], index: 9, kind: input, shape index: {}]   ;;  %s1858_s10 = inlined_call_operand.vmem [shape: f32[1,128], index: 10, kind: input, shape index: {}]   ;;  %s1859_s11 = inlined_call_operand.hbm [shape: f32[4,128], index: 11, kind: output, shape index: {0}]   ;;  %s1860_s12 = inlined_call_operand.vmem [shape: f32[4,128], index: 12, kind: output, shape index: {1}]  }
   0x1   :  { %v46_v0 = vld [vmem:[%s1848_s0] sm:$0xff]  ;;  %v47_v1 = vld [vmem:[%s1848_s0 + $0x8] sm:$0xff] }
   0x2   :  { %52 = vst [vmem:[#allocation1] ss:$2 sm:$0xff] %v46_v0 }
   0x3   :  { %54 = vst [vmem:[#allocation1 + $0x10] ss:$2 sm:$0xff] %v47_v1 }
   0x4   :  { %18 = vsyncpa [#allocation5], 0  ;;  %v48_v2 = vld [vmem:[%s1849_s1] sm:$0xff]  ;;  %v49_v3 = vld [vmem:[%s1849_s1 + $0x8] sm:$0xff]  ;;  %vm63_vm0 = vcmask 1043456   ;;  %vm845_vm4 = vcmask 523264  }
   0x5   :  { %v1462_v27 = vmov 839922192   ;;  %s1463_s0 = smov 96   ;;  %vm902_vm5 = vcmask 257024   ;;  %s1465_s30 = smov 127   ;;  %vm897_vm12 = vcmask 27648  }
   0x6   :  { %v1556_v28 = vunpack.c.l.s4 %v1462_v27  ;;  %v1383_v27 = vld [vmem:[%s1851_s3 + $0x88] sm:$0xff]  ;;  %s1470_s23 = smov [#allocation4]   ;;  %s1053_s27 = sshll.u32 %s1859_s11, 4  ;;  %s1054_s27 = int_to_ptr.hbm [resolvable:$true] %s1053_s27 }
   0x7   :  { %s1051_s24 = sshll.u32 %s1470_s23, 4  ;;  %s1052_s24 = int_to_ptr.vmem [resolvable:$true] %s1051_s24 }
   0x8   :  { %v100_v30 = vunpack.c.0.s8 %v1556_v28  ;;  %v1350_v28 = vld [vmem:[%s1850_s2 + $0x80] sm:$0xff] }
   0x9   :  { %v55_v4 = vld.sshfl [vmem:[#allocation1] sm:$0xff pattern:$0x75316420]  ;;  %v56_v5 = vld.sshfl [vmem:[#allocation1 + $0x8] sm:$0xff pattern:$0x75316420] }
   0xa   :  { %v57_v6 = vld.sshfl [vmem:[#allocation1 + $0x10] sm:$0xff pattern:$0x75316420]  ;;  %v58_v7 = vld.sshfl [vmem:[#allocation1 + $0x18] sm:$0xff pattern:$0x75316420] }
   0xb   :  { %v64_v8 = vsel %vm63_vm0, %v55_v4, 0.0  ;;  %v65_v9 = vsel %vm63_vm0, %v56_v5, 0.0  ;;  %v67_v10 = vsel %vm63_vm0, %v57_v6, 0.0  ;;  %75 = vst [vmem:[#allocation1] ss:$2 sm:$0xff] %v48_v2  ;;  %v69_v12 = vsel %vm63_vm0, %v58_v7, 0.0 }
   0xc   :  { %v66_v11 = vadd.f32 %v65_v9, %v64_v8  ;;  %77 = vst [vmem:[#allocation1 + $0x10] ss:$2 sm:$0xff] %v49_v3  ;;  %v1372_v4 = vld [vmem:[%s1851_s3 + $0x30] sm:$0xff]  ;;  %v1371_v8 = vld [vmem:[%s1851_s3 + $0x28] sm:$0xff] }
   0xd   :  { %v1380_v5 = vld [vmem:[%s1851_s3 + $0x70] sm:$0xff]  ;;  %v1379_v9 = vld [vmem:[%s1851_s3 + $0x68] sm:$0xff] }
   0xe   :  { %v68_v13 = vadd.f32 %v67_v10, %v66_v11  ;;  %v1388_v6 = vld [vmem:[%s1851_s3 + $0xb0] sm:$0xff]  ;;  %v1387_v10 = vld [vmem:[%s1851_s3 + $0xa8] sm:$0xff] }
   0xf   :  { %v1396_v7 = vld [vmem:[%s1851_s3 + $0xf0] sm:$0xff]  ;;  %v1395_v11 = vld [vmem:[%s1851_s3 + $0xe8] sm:$0xff] }
  0x10   :  { %v70_v14 = vadd.f32 %v69_v12, %v68_v13  ;;  %v1370_v12 = vld [vmem:[%s1851_s3 + $0x20] sm:$0xff] }
  0x11   :  { %v1378_v13 = vld [vmem:[%s1851_s3 + $0x60] sm:$0xff] }
  0x12   :  { %71 = vadd.xlane.f32.xlu0 %v70_v14  ;;  %v78_v15 = vld.sshfl [vmem:[#allocation1] sm:$0xff pattern:$0x75316420]  ;;  %v79_v16 = vld.sshfl [vmem:[#allocation1 + $0x8] sm:$0xff pattern:$0x75316420] }
  0x13   :  { %v80_v17 = vld.sshfl [vmem:[#allocation1 + $0x10] sm:$0xff pattern:$0x75316420]  ;;  %v81_v18 = vld.sshfl [vmem:[#allocation1 + $0x18] sm:$0xff pattern:$0x75316420] }
  0x14   :  { %v86_v19 = vsel %vm63_vm0, %v78_v15, 0.0  ;;  %v87_v20 = vsel %vm63_vm0, %v79_v16, 0.0  ;;  %v89_v21 = vsel %vm63_vm0, %v80_v17, 0.0  ;;  %v91_v23 = vsel %vm63_vm0, %v81_v18, 0.0  ;;  %v1386_v14 = vld [vmem:[%s1851_s3 + $0xa0] sm:$0xff]  ;;  %v1369_v16 = vld [vmem:[%s1851_s3 + $0x18] sm:$0xff] }
  0x15   :  { %v88_v22 = vadd.f32 %v87_v20, %v86_v19  ;;  %v1394_v15 = vld [vmem:[%s1851_s3 + $0xe0] sm:$0xff]  ;;  %v1377_v17 = vld [vmem:[%s1851_s3 + $0x58] sm:$0xff]  ;;  %v1368_v20 = vld [vmem:[%s1851_s3 + $0x10] sm:$0xff] }
  0x16   :  { %v1385_v18 = vld [vmem:[%s1851_s3 + $0x98] sm:$0xff] }
  0x17   :  { %v90_v24 = vadd.f32 %v89_v21, %v88_v22  ;;  %v1393_v19 = vld [vmem:[%s1851_s3 + $0xd8] sm:$0xff]  ;;  %v1376_v21 = vld [vmem:[%s1851_s3 + $0x50] sm:$0xff] }
  0x18   :  { %v1384_v22 = vld [vmem:[%s1851_s3 + $0x90] sm:$0xff] }
  0x19   :  { %v92_v25 = vadd.f32 %v91_v23, %v90_v24  ;;  %v1392_v24 = vld [vmem:[%s1851_s3 + $0xd0] sm:$0xff] }
  0x1b   :  { %93 = vadd.xlane.f32.xlu0 %v92_v25  ;;  %v1367_v25 = vld [vmem:[%s1851_s3 + $0x8] sm:$0xff] }
  0x85   :  { %v72_v26 = vpop.xlane.xlu0 %71 }
  0x8e   :  { %v94_v29 = vpop.xlane.xlu0 %93 }
  0x8f   :  { %v95_v31 = vadd.f32 %v94_v29, %v72_v26  ;;  %v1375_v26 = vld [vmem:[%s1851_s3 + $0x48] sm:$0xff] }
  0x90   :  { %v1391_v29 = vld [vmem:[%s1851_s3 + $0xc8] sm:$0xff] }
  0x91   :  { %v96_v32 = vmul.f32 0.0009765625, %v95_v31  ;;  %v1366_v31 = vld [vmem:[%s1851_s3] sm:$0xff] }
  0x93   :  { %v101_v33 = vperm.slane %v96_v32, %v100_v30  ;;  %v1374_v32 = vld [vmem:[%s1851_s3 + $0x40] sm:$0xff] }
  0x95   :  { %v1561_v34 = vsub.f32 %v46_v0, %v101_v33  ;;  %v1563_v35 = vsub.f32 %v47_v1, %v101_v33  ;;  %v1569_v38 = vsub.f32 %v48_v2, %v101_v33  ;;  %v1571_v39 = vsub.f32 %v49_v3, %v101_v33  ;;  %v1373_v0 = vld [vmem:[%s1851_s3 + $0x38] sm:$0xff]  ;;  %v1382_v33 = vld [vmem:[%s1851_s3 + $0x80] sm:$0xff] }
  0x96   :  { %v1381_v1 = vld [vmem:[%s1851_s3 + $0x78] sm:$0xff]  ;;  %532 = vmatpush.bf16.msra.mxu0 %v1373_v0 }
  0x97   :  { %v107_v36 = vmul.f32 %v1561_v34, %v1561_v34  ;;  %v108_v37 = vmul.f32 %v1563_v35, %v1563_v35  ;;  %v131_v40 = vmul.f32 %v1569_v38, %v1569_v38  ;;  %v132_v43 = vmul.f32 %v1571_v39, %v1571_v39  ;;  %v1389_v2 = vld [vmem:[%s1851_s3 + $0xb8] sm:$0xff]  ;;  %545 = vmatpush.bf16.msra.mxu1 %v1381_v1 }
  0x98   :  { %v1397_v3 = vld [vmem:[%s1851_s3 + $0xf8] sm:$0xff]  ;;  %558 = vmatpush.bf16.msra.mxu2 %v1389_v2 }
  0x99   :  { %111 = vst [vmem:[#allocation1] ss:$2 sm:$0xff] %v107_v36  ;;  %571 = vmatpush.bf16.msra.mxu3 %v1397_v3  ;;  %v1390_v36 = vld [vmem:[%s1851_s3 + $0xc0] sm:$0xff]  ;;  %v1353_v0 = vld [vmem:[%s1850_s2 + $0x98] sm:$0xff]  ;;  %v1336_v3 = vld [vmem:[%s1850_s2 + $0x10] sm:$0xff] }
  0x9a   :  { %113 = vst [vmem:[#allocation1 + $0x10] ss:$2 sm:$0xff] %v108_v37  ;;  %533 = vmatpush.bf16.msra.mxu0 %v1372_v4  ;;  %v1341_v37 = vld [vmem:[%s1850_s2 + $0x38] sm:$0xff]  ;;  %v1344_v4 = vld [vmem:[%s1850_s2 + $0x50] sm:$0xff] }
  0x9b   :  { %546 = vmatpush.bf16.msra.mxu1 %v1380_v5  ;;  %v1361_v1 = vld [vmem:[%s1850_s2 + $0xd8] sm:$0xff]  ;;  %v1352_v5 = vld [vmem:[%s1850_s2 + $0x90] sm:$0xff] }
  0x9c   :  { %559 = vmatpush.bf16.msra.mxu2 %v1388_v6  ;;  %v1360_v6 = vld [vmem:[%s1850_s2 + $0xd0] sm:$0xff] }
  0x9d   :  { %572 = vmatpush.bf16.msra.mxu3 %v1396_v7 }
  0x9e   :  { %534 = vmatpush.bf16.msra.mxu0 %v1371_v8 }
  0x9f   :  { %547 = vmatpush.bf16.msra.mxu1 %v1379_v9  ;;  %v1335_v9 = vld [vmem:[%s1850_s2 + $0x8] sm:$0xff] }
  0xa0   :  { %v114_v41 = vld.sshfl [vmem:[#allocation1] sm:$0xff pattern:$0x75316420]  ;;  %v115_v42 = vld.sshfl [vmem:[#allocation1 + $0x8] sm:$0xff pattern:$0x75316420]  ;;  %560 = vmatpush.bf16.msra.mxu2 %v1387_v10 }
  0xa1   :  { %v116_v44 = vld.sshfl [vmem:[#allocation1 + $0x10] sm:$0xff pattern:$0x75316420]  ;;  %v117_v45 = vld.sshfl [vmem:[#allocation1 + $0x18] sm:$0xff pattern:$0x75316420]  ;;  %573 = vmatpush.bf16.msra.mxu3 %v1395_v11 }
  0xa2   :  { %v122_v46 = vsel %vm63_vm0, %v114_v41, 0.0  ;;  %v123_v47 = vsel %vm63_vm0, %v115_v42, 0.0  ;;  %135 = vst [vmem:[#allocation1] ss:$2 sm:$0xff] %v131_v40  ;;  %v125_v49 = vsel %vm63_vm0, %v116_v44, 0.0  ;;  %v127_v51 = vsel %vm63_vm0, %v117_v45, 0.0  ;;  %535 = vmatpush.bf16.msra.mxu0 %v1370_v12 }
  0xa3   :  { %v124_v48 = vadd.f32 %v123_v47, %v122_v46  ;;  %137 = vst [vmem:[#allocation1 + $0x10] ss:$2 sm:$0xff] %v132_v43  ;;  %548 = vmatpush.bf16.msra.mxu1 %v1378_v13  ;;  %v1349_v40 = vld [vmem:[%s1850_s2 + $0x78] sm:$0xff]  ;;  %v1340_v45 = vld [vmem:[%s1850_s2 + $0x30] sm:$0xff]  ;;  %v1343_v10 = vld [vmem:[%s1850_s2 + $0x48] sm:$0xff] }
  0xa4   :  { %561 = vmatpush.bf16.msra.mxu2 %v1386_v14  ;;  %v1357_v42 = vld [vmem:[%s1850_s2 + $0xb8] sm:$0xff]  ;;  %v1348_v46 = vld [vmem:[%s1850_s2 + $0x70] sm:$0xff]  ;;  %v1351_v11 = vld [vmem:[%s1850_s2 + $0x88] sm:$0xff] }
  0xa5   :  { %v126_v50 = vadd.f32 %v125_v49, %v124_v48  ;;  %574 = vmatpush.bf16.msra.mxu3 %v1394_v15  ;;  %v1365_v43 = vld [vmem:[%s1850_s2 + $0xf8] sm:$0xff]  ;;  %v1356_v48 = vld [vmem:[%s1850_s2 + $0xb0] sm:$0xff]  ;;  %v1359_v13 = vld [vmem:[%s1850_s2 + $0xc8] sm:$0xff] }
  0xa6   :  { %536 = vmatpush.bf16.msra.mxu0 %v1369_v16  ;;  %v1364_v49 = vld [vmem:[%s1850_s2 + $0xf0] sm:$0xff]  ;;  %v1334_v15 = vld [vmem:[%s1850_s2] sm:$0xff] }
  0xa7   :  { %v128_v52 = vadd.f32 %v127_v51, %v126_v50  ;;  %549 = vmatpush.bf16.msra.mxu1 %v1377_v17  ;;  %v1339_v51 = vld [vmem:[%s1850_s2 + $0x28] sm:$0xff]  ;;  %v1342_v16 = vld [vmem:[%s1850_s2 + $0x40] sm:$0xff] }
  0xa8   :  { %562 = vmatpush.bf16.msra.mxu2 %v1385_v18 }
  0xa9   :  { %129 = vadd.xlane.f32.xlu1 %v128_v52  ;;  %v138_v53 = vld.sshfl [vmem:[#allocation1] sm:$0xff pattern:$0x75316420]  ;;  %v139_v54 = vld.sshfl [vmem:[#allocation1 + $0x8] sm:$0xff pattern:$0x75316420]  ;;  %575 = vmatpush.bf16.msra.mxu3 %v1393_v19 }
  0xaa   :  { %v140_v55 = vld.sshfl [vmem:[#allocation1 + $0x10] sm:$0xff pattern:$0x75316420]  ;;  %v146_v56 = vsel %vm63_vm0, %v138_v53, 0.0  ;;  %v147_v57 = vsel %vm63_vm0, %v139_v54, 0.0  ;;  %537 = vmatpush.bf16.msra.mxu0 %v1368_v20  ;;  %v1347_v52 = vld [vmem:[%s1850_s2 + $0x68] sm:$0xff] }
  0xab   :  { %v141_v58 = vld.sshfl [vmem:[#allocation1 + $0x18] sm:$0xff pattern:$0x75316420]  ;;  %v148_v59 = vadd.f32 %v147_v57, %v146_v56  ;;  %v149_v60 = vsel %vm63_vm0, %v140_v55, 0.0  ;;  %550 = vmatpush.bf16.msra.mxu1 %v1376_v21  ;;  %v1355_v53 = vld [vmem:[%s1850_s2 + $0xa8] sm:$0xff]  ;;  %v1338_v55 = vld [vmem:[%s1850_s2 + $0x20] sm:$0xff] }
  0xac   :  { %v151_v62 = vsel %vm63_vm0, %v141_v58, 0.0  ;;  %563 = vmatpush.bf16.msra.mxu2 %v1384_v22  ;;  %v1363_v54 = vld [vmem:[%s1850_s2 + $0xe8] sm:$0xff]  ;;  %v1346_v56 = vld [vmem:[%s1850_s2 + $0x60] sm:$0xff]  ;;  %vm939_vm0 = vcmask 1041408  }
  0xad   :  { %v150_v61 = vadd.f32 %v149_v60, %v148_v59  ;;  %576 = vmatpush.bf16.msra.mxu3 %v1392_v24  ;;  %v1354_v57 = vld [vmem:[%s1850_s2 + $0xa0] sm:$0xff] }
  0xae   :  { %538 = vmatpush.bf16.msra.mxu0 %v1367_v25  ;;  %v1362_v58 = vld [vmem:[%s1850_s2 + $0xe0] sm:$0xff] }
  0xaf   :  { %v152_v63 = vadd.f32 %v151_v62, %v150_v61  ;;  %551 = vmatpush.bf16.msra.mxu1 %v1375_v26  ;;  %v1337_v62 = vld [vmem:[%s1850_s2 + $0x18] sm:$0xff] }
  0xb0   :  { %564 = vmatpush.bf16.msra.mxu2 %v1383_v27 }
  0xb1   :  { %153 = vadd.xlane.f32.xlu1 %v152_v63  ;;  %577 = vmatpush.bf16.msra.mxu3 %v1391_v29  ;;  %v1345_v63 = vld [vmem:[%s1850_s2 + $0x58] sm:$0xff] }
  0xb2   :  { %539 = vmatpush.bf16.msra.mxu0 %v1366_v31 }
  0xb3   :  { %552 = vmatpush.bf16.msra.mxu1 %v1374_v32 }
  0xb4   :  { %565 = vmatpush.bf16.msra.mxu2 %v1382_v33 }
  0xb5   :  { %578 = vmatpush.bf16.msra.mxu3 %v1390_v36 }
  0xb6   :  { %776 = vmatpush.bf16.msrb.mxu0 %v1341_v37  ;;  %v840_v37 = vld [vmem:[%s1853_s5 + $0x38] sm:$0xff] }
  0xb7   :  { %789 = vmatpush.bf16.msrb.mxu1 %v1349_v40  ;;  %v839_v40 = vld [vmem:[%s1853_s5 + $0x30] sm:$0xff] }
  0xb8   :  { %802 = vmatpush.bf16.msrb.mxu2 %v1357_v42  ;;  %v837_v42 = vld [vmem:[%s1853_s5 + $0x20] sm:$0xff] }
  0xb9   :  { %815 = vmatpush.bf16.msrb.mxu3 %v1365_v43  ;;  %v836_v43 = vld [vmem:[%s1853_s5 + $0x18] sm:$0xff] }
  0xba   :  { %777 = vmatpush.bf16.msrb.mxu0 %v1340_v45  ;;  %v834_v45 = vld [vmem:[%s1853_s5 + $0x8] sm:$0xff] }
  0xbb   :  { %790 = vmatpush.bf16.msrb.mxu1 %v1348_v46  ;;  %v833_v46 = vld [vmem:[%s1853_s5] sm:$0xff] }
  0xbc   :  { %803 = vmatpush.bf16.msrb.mxu2 %v1356_v48 }
  0xbd   :  { %816 = vmatpush.bf16.msrb.mxu3 %v1364_v49 }
  0xbe   :  { %778 = vmatpush.bf16.msrb.mxu0 %v1339_v51 }
  0xbf   :  { %791 = vmatpush.bf16.msrb.mxu1 %v1347_v52 }
  0xc0   :  { %804 = vmatpush.bf16.msrb.mxu2 %v1355_v53 }
  0xc1   :  { %817 = vmatpush.bf16.msrb.mxu3 %v1363_v54 }
  0xc2   :  { %779 = vmatpush.bf16.msrb.mxu0 %v1338_v55 }
  0xc3   :  { %792 = vmatpush.bf16.msrb.mxu1 %v1346_v56 }
  0xc4   :  { %805 = vmatpush.bf16.msrb.mxu2 %v1354_v57 }
  0xc5   :  { %818 = vmatpush.bf16.msrb.mxu3 %v1362_v58 }
  0xc6   :  { %780 = vmatpush.bf16.msrb.mxu0 %v1337_v62 }
  0xc7   :  { %793 = vmatpush.bf16.msrb.mxu1 %v1345_v63 }
  0xc8   :  { %806 = vmatpush.bf16.msrb.mxu2 %v1353_v0 }
  0xc9   :  { %819 = vmatpush.bf16.msrb.mxu3 %v1361_v1  ;;  %v1414_v1 = vld [vmem:[%s1852_s4] ss:$0 sm:$0xff] }
  0xca   :  { %781 = vmatpush.bf16.msrb.mxu0 %v1336_v3 }
  0xcb   :  { %794 = vmatpush.bf16.msrb.mxu1 %v1344_v4 }
  0xcc   :  { %807 = vmatpush.bf16.msrb.mxu2 %v1352_v5 }
  0xcd   :  { %820 = vmatpush.bf16.msrb.mxu3 %v1360_v6 }
  0xce   :  { %782 = vmatpush.bf16.msrb.mxu0 %v1335_v9 }
  0xcf   :  { %795 = vmatpush.bf16.msrb.mxu1 %v1343_v10  ;;  %v1415_v10 = vld [vmem:[%s1854_s6] ss:$0 sm:$0xff] }
  0xd0   :  { %808 = vmatpush.bf16.msrb.mxu2 %v1351_v11 }
  0xd1   :  { %821 = vmatpush.bf16.msrb.mxu3 %v1359_v13 }
  0xd2   :  { %783 = vmatpush.bf16.msrb.mxu0 %v1334_v15 }
  0xd3   :  { %796 = vmatpush.bf16.msrb.mxu1 %v1342_v16 }
  0xd4   :  { %809 = vmatpush.bf16.msrb.mxu2 %v1350_v28 }
 0x11c   :  { %v130_v23 = vpop.xlane.xlu1 %129 }
 0x124   :  { %v154_v41 = vpop.xlane.xlu1 %153 }
 0x125   :  { %v155_v44 = vadd.f32 %v154_v41, %v130_v23  ;;  %v838_v41 = vld [vmem:[%s1853_s5 + $0x28] sm:$0xff] }
 0x127   :  { %v156_v47 = vmul.f32 0.0009765625, %v155_v44  ;;  %v835_v44 = vld [vmem:[%s1853_s5 + $0x10] sm:$0xff] }
 0x129   :  { %v157_v50 = vadd.f32 1e-05, %v156_v47 }
 0x12b   :  { %1422 = vrsqrt.f32 %v157_v50  ;;  %vm164_vm2 = vweird.f32 %v157_v50 }
 0x131   :  { %v1423_v59 = vpop.eup %1422 }
 0x132   :  { %v159_v60 = vmul.f32 %v1423_v59, %v157_v50  ;;  %vm165_vm1 = vweird.f32 %v1423_v59 }
 0x133   :  { %vm166_vm3 = vmor %vm164_vm2, %vm165_vm1  ;;  %vm947_vm1 = vcmask 254976   ;;  %vm1027_vm2 = vcmask 261120  }
 0x134   :  { %v160_v61 = vmul.f32 %v1423_v59, %v159_v60 }
 0x136   :  { %v161_v2 = vmul.f32 0.5, %v160_v61 }
 0x138   :  { %v162_v7 = vsub.f32 1.5, %v161_v2 }
 0x13a   :  { %v163_v8 = vmul.f32 %v1423_v59, %v162_v7 }
 0x13c   :  { %v167_v12 = vsel %vm166_vm3, %v1423_v59, %v163_v8 }
 0x13d   :  { %v172_v14 = vperm.slane %v167_v12, %v100_v30  ;;  %v1358_v30 = vld [vmem:[%s1850_s2 + $0xc0] sm:$0xff] }
 0x13e   :  { %822 = vmatpush.bf16.msrb.mxu3 %v1358_v30 }
 0x13f   :  { %v174_v17 = vmul.f32 %v172_v14, %v1561_v34  ;;  %v175_v18 = vmul.f32 %v172_v14, %v1563_v35  ;;  %v193_v34 = vmul.f32 %v172_v14, %v1569_v38  ;;  %v194_v20 = vmul.f32 %v172_v14, %v1571_v39 }
 0x141   :  { %178 = vst [vmem:[#allocation1] ss:$2 sm:$0xff] %v174_v17  ;;  %v869_v17 = vlaneseq }
 0x142   :  { %180 = vst [vmem:[#allocation1 + $0x10] ss:$2 sm:$0xff] %v175_v18 }
 0x143   :  { %v870_v30 = vand.u32 127, %v869_v17 }
 0x145   :  { %vm871_vm8 = vcmp.eq.s32.totalorder %v870_v30, 0 }
 0x148   :  { %v181_v19 = vld.sshfl [vmem:[#allocation1] sm:$0xff pattern:$0x75316420]  ;;  %v182_v35 = vld.sshfl [vmem:[#allocation1 + $0x8] sm:$0xff pattern:$0x75316420] }
 0x149   :  { %197 = vst [vmem:[#allocation1] ss:$2 sm:$0xff] %v193_v34  ;;  %v183_v21 = vld.sshfl [vmem:[#allocation1 + $0x10] sm:$0xff pattern:$0x75316420]  ;;  %v189_v38 = vpack.c.bf16 %v181_v19, %v181_v19  ;;  %v190_v33 = vpack.c.bf16 %v182_v35, %v182_v35 }
 0x14a   :  { %v184_v22 = vld.sshfl [vmem:[#allocation1 + $0x18] sm:$0xff pattern:$0x75316420]  ;;  %v191_v39 = vpack.c.bf16 %v183_v21, %v183_v21 }
 0x14b   :  { %199 = vst [vmem:[#allocation1 + $0x10] ss:$2 sm:$0xff] %v194_v20  ;;  %v192_v36 = vpack.c.bf16 %v184_v22, %v184_v22 }
 0x150   :  { %v200_v23 = vld.sshfl [vmem:[#allocation1] sm:$0xff pattern:$0x75316420]  ;;  %v201_v24 = vld.sshfl [vmem:[#allocation1 + $0x8] sm:$0xff pattern:$0x75316420] }
 0x151   :  { %v208_v25 = vpack.c.bf16 %v200_v23, %v200_v23  ;;  %v209_v26 = vpack.c.bf16 %v201_v24, %v201_v24 }
 0x152   :  { %v202_v27 = vld.sshfl [vmem:[#allocation1 + $0x10] sm:$0xff pattern:$0x75316420]  ;;  %v203_v29 = vld.sshfl [vmem:[#allocation1 + $0x18] sm:$0xff pattern:$0x75316420] }
 0x153   :  { %540 = vmatmul.bf16.vlgmr.msra.gmra.mxu0 %v208_v25  ;;  %553 = vmatmul.bf16.vlgmr.msra.gmra.mxu1 %v209_v26  ;;  %v210_v31 = vpack.c.bf16 %v202_v27, %v202_v27  ;;  %v211_v32 = vpack.c.bf16 %v203_v29, %v203_v29  ;;  %v1464_v25 = vmov 32.0  }
 0x154   :  { %857 = vmatpush.msra.mxu0 %v840_v37 }
 0x155   :  { %566 = vmatmul.bf16.vlgmr.msra.gmra.mxu2 %v210_v31  ;;  %579 = vmatmul.bf16.vlgmr.msra.gmra.mxu3 %v211_v32 }
 0x156   :  { %858 = vmatpush.msra.mxu0 %v839_v40  ;;  %v1466_v40 = vmov 2  }
 0x157   :  { %1411 = vset.pattern.permute.xlu2 %v1466_v40 }
 0x158   :  { %859 = vmatpush.msra.mxu0 %v838_v41  ;;  %v1467_v41 = vmov 0  }
 0x159   :  { %1409 = vset.pattern.permute.xlu0 %v1467_v41 }
 0x15a   :  { %860 = vmatpush.msra.mxu0 %v837_v42 }
 0x15c   :  { %861 = vmatpush.msra.mxu0 %v836_v43 }
 0x15e   :  { %862 = vmatpush.msra.mxu0 %v835_v44 }
 0x160   :  { %863 = vmatpush.msra.mxu0 %v834_v45 }
 0x162   :  { %864 = vmatpush.msra.mxu0 %v833_v46  ;;  %v1468_v46 = vmov 1  }
 0x163   :  { %784 = vmatmul.bf16.vlgmr.msrb.gmra.mxu0 %v189_v38  ;;  %797 = vmatmul.bf16.vlgmr.msrb.gmra.mxu1 %v190_v33 }
 0x164   :  { %1410 = vset.pattern.permute.xlu1 %v1468_v46 }
 0x165   :  { %810 = vmatmul.bf16.vlgmr.msrb.gmra.mxu2 %v191_v39  ;;  %823 = vmatmul.bf16.vlgmr.msrb.gmra.mxu3 %v192_v36 }
 0x1d0   :  { %v541_v47 = vpop.f32.mrf.mxu0  ;;  %v554_v48 = vpop.f32.mrf.mxu1 }
 0x1d1   :  { %v555_v53 = vadd.f32 %v554_v48, %v541_v47 }
 0x1d8   :  { %v567_v49 = vpop.f32.mrf.mxu2  ;;  %v580_v50 = vpop.f32.mrf.mxu3 }
 0x1d9   :  { %v543_v51 = vpop.f32.mrf.mxu0  ;;  %v556_v52 = vpop.f32.mrf.mxu1  ;;  %v568_v54 = vadd.f32 %v567_v49, %v555_v53 }
 0x1db   :  { %v581_v57 = vadd.f32 %v580_v50, %v568_v54  ;;  %v1469_v50 = vmov 3   ;;  %v1399_v54 = vld [vmem:[%s1855_s7 + $0x8] sm:$0xff] }
 0x1dc   :  { %1037 = vmatpush.bf16.msra.mxu1 %v1399_v54 }
 0x1e0   :  { %v569_v55 = vpop.f32.mrf.mxu2  ;;  %v582_v56 = vpop.f32.mrf.mxu3 }
 0x1e1   :  { %v785_v58 = vpop.f32.mrf.mxu0  ;;  %v798_v59 = vpop.f32.mrf.mxu1 }
 0x1e2   :  { %v786_v60 = vadd.f32 %v785_v58, %v581_v57 }
 0x1e4   :  { %v799_v61 = vadd.f32 %v798_v59, %v786_v60 }
 0x1e8   :  { %v811_v62 = vpop.f32.mrf.mxu2  ;;  %v824_v63 = vpop.f32.mrf.mxu3 }
 0x1e9   :  { %v812_v0 = vadd.f32 %v811_v62, %v799_v61  ;;  %v787_v2 = vpop.f32.mrf.mxu0  ;;  %v800_v3 = vpop.f32.mrf.mxu1 }
 0x1ea   :  { %v1417_v3 = vld [vmem:[%s1857_s9] ss:$0 sm:$0xff] }
 0x1eb   :  { %v825_v4 = vadd.f32 %v824_v63, %v812_v0  ;;  %v1398_v63 = vld [vmem:[%s1855_s7] sm:$0xff] }
 0x1ec   :  { %1038 = vmatpush.bf16.msra.mxu1 %v1398_v63 }
 0x1ed   :  { %v832_v5 = vadd.f32 %v1414_v1, %v825_v4 }
 0x1ef   :  { %899 = vrot.lane.b32.xlu2 %v832_v5, %s1463_s0  ;;  %1322 = vmatmul.msk.f32.vlgmr.msra.gmra.mxu0 %vm845_vm4, %v832_v5 }
 0x1f0   :  { %v813_v6 = vpop.f32.mrf.mxu2  ;;  %v826_v7 = vpop.f32.mrf.mxu3 }
 0x1f1   :  { %v1418_v6 = vld [vmem:[%s1858_s10] ss:$0 sm:$0xff] }
 0x249   :  { %v900_v8 = vpop.permute.xlu2 %899 }
 0x24a   :  { %v903_v9 = vsel %vm902_vm5, %v900_v8, 0.0 }
 0x24b   :  { %904 = vadd.xlane.f32.xlu2 %v903_v9  ;;  %v1416_v9 = vld [vmem:[%s1857_s9 + $0x2] ss:$0 sm:$0xff] }
 0x26c   :  { %v866_v11 = vpop.f32.mrf.mxu0 }
 0x26d   :  { %v867_v12 = vadd.f32 %v1415_v10, %v866_v11  ;;  %v1420_v11 = vld [vmem:[%s1857_s9 + $0x3] ss:$0 sm:$0xff] }
 0x26f   :  { %v1323_v13 = vmul.f32 -1.442695, %v867_v12 }
 0x271   :  { %1424 = vpow2.f32 %v1323_v13 }
 0x277   :  { %v1425_v14 = vpop.eup %1424 }
 0x278   :  { %v875_v15 = vadd.f32 1.0, %v1425_v14 }
 0x27a   :  { %1426 = vrcp.f32 %v875_v15  ;;  %v887_v34 = vand.u32 2147483648, %v875_v15  ;;  %v885_v35 = vand.u32 2147483647, %v875_v15  ;;  %vm881_vm7 = vweird.f32 %v875_v15 }
 0x27b   :  { %1428 = vrcp.f32 %v1464_v25  ;;  %v1421_v25 = vld [vmem:[%s1856_s8] ss:$0 sm:$0xff] }
 0x27c   :  { %v888_v21 = vor.u32 1.1754944e-38, %v887_v34  ;;  %vm886_vm10 = vcmp.eq.f32.partialorder %v885_v35, 8.507059e+37 }
 0x280   :  { %v1427_v16 = vpop.eup %1426 }
 0x281   :  { %v877_v18 = vmul.f32 %v1427_v16, %v875_v15  ;;  %vm882_vm6 = vweird.f32 %v1427_v16  ;;  %v1429_v26 = vpop.eup %1428 }
 0x282   :  { %vm883_vm9 = vmor %vm881_vm7, %vm882_vm6  ;;  %v907_v27 = vmul.f32 32.0, %v1429_v26  ;;  %vm911_vm11 = vweird.f32 %v1429_v26 }
 0x283   :  { %v878_v28 = vsub.f32 1.0, %v877_v18 }
 0x284   :  { %v908_v29 = vsub.f32 1.0, %v907_v27 }
 0x285   :  { %v879_v19 = vmul.f32 %v1427_v16, %v878_v28 }
 0x286   :  { %v909_v31 = vmul.f32 %v1429_v26, %v908_v29 }
 0x287   :  { %v880_v20 = vadd.f32 %v1427_v16, %v879_v19 }
 0x288   :  { %v910_v32 = vadd.f32 %v1429_v26, %v909_v31 }
 0x289   :  { %v884_v22 = vsel %vm883_vm9, %v1427_v16, %v880_v20 }
 0x28a   :  { %v889_v23 = vsel %vm886_vm10, %v888_v21, %v884_v22  ;;  %v912_v38 = vsel %vm911_vm11, %v1429_v26, %v910_v32 }
 0x28b   :  { %v891_v24 = vsel %vm871_vm8, %v889_v23, %v867_v12 }
 0x28c   :  { %892 = vst [vmem:[%s1860_s12] sm:$0xf] %v891_v24 }
 0x2be   :  { %v905_v33 = vpop.xlane.xlu2 %904 }
 0x2bf   :  { %v913_v39 = vmul.f32 %v912_v38, %v905_v33 }
 0x2c1   :  { %v914_v36 = vsub.f32 %v832_v5, %v913_v39  ;;  %v1419_v5 = vld [vmem:[%s1857_s9 + $0x1] ss:$0 sm:$0xff] }
 0x2c3   :  { %v915_v37 = vmul.f32 %v914_v36, %v914_v36 }
 0x2c5   :  { %917 = vrot.lane.b32.xlu0 %v915_v37, %s1463_s0 }
 0x2cd   :  { %894 = vrot.lane.b32.xlu0 %v867_v12, %s1465_s30 }
 0x337   :  { %v918_v42 = vpop.permute.xlu0 %917 }
 0x338   :  { %v920_v43 = vsel %vm902_vm5, %v918_v42, 0.0 }
 0x339   :  { %921 = vadd.xlane.f32.xlu1 %v920_v43 }
 0x33f   :  { %v895_v44 = vpop.permute.xlu0 %894 }
 0x340   :  { %898 = vst.msk [vmem:[#allocation3] sm:$0xf] %vm897_vm12, %v895_v44 }
 0x347   :  { %v949_v45 = vld [vmem:[#allocation3] sm:$0xf] }
 0x348   :  { %973 = vperm.xlu2 %1411, %v949_v45   ;;  %954 = vperm.xlu0 %1409, %v949_v45  }
 0x350   :  { %1413 = vset.pattern.permute.xlu0 %v1469_v50 }
 0x3a2   :  { %v974_v12 = vpop.permute.xlu2 %973 }
 0x3a3   :  { %v977_v15 = vmul.f32 %v1416_v9, %v974_v12 }
 0x3ac   :  { %v922_v47 = vpop.xlane.xlu1 %921 }
 0x3ad   :  { %v923_v48 = vmul.f32 %v922_v47, %v912_v38 }
 0x3af   :  { %v924_v49 = vadd.f32 1e-05, %v923_v48 }
 0x3b1   :  { %1430 = vrsqrt.f32 %v924_v49  ;;  %vm931_vm14 = vweird.f32 %v924_v49 }
 0x3b7   :  { %v1431_v51 = vpop.eup %1430 }
 0x3b8   :  { %v926_v52 = vmul.f32 %v1431_v51, %v924_v49  ;;  %vm932_vm13 = vweird.f32 %v1431_v51 }
 0x3b9   :  { %vm933_vm15 = vmor %vm931_vm14, %vm932_vm13 }
 0x3ba   :  { %v927_v53 = vmul.f32 %v1431_v51, %v926_v52  ;;  %v955_v4 = vpop.permute.xlu0 %954 }
 0x3bb   :  { %v958_v7 = vmul.f32 %v1417_v3, %v955_v4 }
 0x3bc   :  { %v928_v55 = vmul.f32 0.5, %v927_v53 }
 0x3bd   :  { %v962_v10 = vadd.f32 %v1418_v6, %v958_v7 }
 0x3be   :  { %v929_v56 = vsub.f32 1.5, %v928_v55 }
 0x3c0   :  { %v930_v57 = vmul.f32 %v1431_v51, %v929_v56 }
 0x3c2   :  { %v934_v58 = vsel %vm933_vm15, %v1431_v51, %v930_v57 }
 0x3c3   :  { %v935_v59 = vmul.f32 %v934_v58, %v914_v36 }
 0x3c5   :  { %v936_v60 = vpack.c.bf16 %v935_v59, %v935_v59 }
 0x3c7   :  { %v938_v61 = vrot.slane %v936_v60, 2 }
 0x3c9   :  { %v942_v62 = vsel %vm939_vm0, %v936_v60, %v938_v61 }
 0x3ca   :  { %944 = vrot.lane.b32.xlu1 %v942_v62, %s1463_s0 }
 0x3d2   :  { %965 = vperm.xlu1 %1410, %v949_v45  }
 0x3da   :  { %1412 = vset.pattern.permute.xlu1 %v1469_v50 }
 0x3db   :  { %981 = vperm.xlu1 %1412, %v949_v45  }
 0x43c   :  { %v945_v0 = vpop.permute.xlu1 %944 }
 0x43d   :  { %948 = vst.msk [vmem:[#allocation2] sm:$0x3] %vm947_vm1, %v945_v0 }
 0x444   :  { %v1006_v1 = vld [vmem:[#allocation2] sm:$0x3]  ;;  %v966_v2 = vpop.permute.xlu1 %965 }
 0x445   :  { %1333 = vmatmul.msk.bf16.vlgmr.msra.gmra.mxu1 %vm1027_vm2, %v1006_v1  ;;  %v969_v8 = vmul.f32 %v1419_v5, %v966_v2 }
 0x447   :  { %v970_v14 = vadd.f32 %v969_v8, %v962_v10 }
 0x449   :  { %v978_v17 = vadd.f32 %v977_v15, %v970_v14 }
 0x44d   :  { %v982_v13 = vpop.permute.xlu1 %981 }
 0x44e   :  { %v985_v16 = vmul.f32 %v1420_v11, %v982_v13 }
 0x450   :  { %v986_v18 = vadd.f32 %v985_v16, %v978_v17 }
 0x452   :  { %v1324_v28 = vmul.f32 -1.442695, %v986_v18 }
 0x454   :  { %1432 = vpow2.f32 %v1324_v28 }
 0x45a   :  { %v1433_v30 = vpop.eup %1432 }
 0x45b   :  { %v990_v34 = vadd.f32 1.0, %v1433_v30 }
 0x45d   :  { %1434 = vrcp.f32 %v990_v34  ;;  %v1002_v23 = vand.u32 2147483648, %v990_v34  ;;  %vm996_vm4 = vweird.f32 %v990_v34  ;;  %v1000_v24 = vand.u32 2147483647, %v990_v34 }
 0x45f   :  { %v1003_v27 = vor.u32 1.1754944e-38, %v1002_v23  ;;  %vm1001_vm6 = vcmp.eq.f32.partialorder %v1000_v24, 8.507059e+37 }
 0x463   :  { %v1435_v19 = vpop.eup %1434 }
 0x464   :  { %v992_v35 = vmul.f32 %v1435_v19, %v990_v34  ;;  %vm997_vm3 = vweird.f32 %v1435_v19 }
 0x465   :  { %vm998_vm5 = vmor %vm996_vm4, %vm997_vm3 }
 0x466   :  { %v993_v20 = vsub.f32 1.0, %v992_v35 }
 0x468   :  { %v994_v21 = vmul.f32 %v1435_v19, %v993_v20 }
 0x46a   :  { %v995_v22 = vadd.f32 %v1435_v19, %v994_v21 }
 0x46c   :  { %v999_v26 = vsel %vm998_vm5, %v1435_v19, %v995_v22 }
 0x46d   :  { %v1004_v32 = vsel %vm1001_vm6, %v1003_v27, %v999_v26 }
 0x4c2   :  { %v1040_v29 = vpop.f32.mrf.mxu1 }
 0x4c3   :  { %v1041_v31 = vadd.f32 %v1421_v25, %v1040_v29 }
 0x4c5   :  { %v1044_v38 = vmul.f32 %v1041_v31, %v1004_v32 }
 0x4c7   :  { %1045 = vst [vmem:[#allocation4] sm:$0xf] %v1044_v38 }
 0x4c8   :  { %1056 = dma.vmem_to_hbm [thread:$0]  %s1052_s24, 64, %s1054_s27, [#allocation5]  }
 0x4ca   :  { %v1042_v33 = vpop.f32.mrf.mxu1 }
 0x4cb   :  { %1460 = dma.done.wait [#allocation5], 64  }
 0x4cc   :  { %1461 = vsyncadd [#allocation5], 4294967232 }
 0x4cd   :  { %1065 = vsyncpa [#allocation5], 1 }

</bundles_post_ra>
